<compile_context>
chip_gen: v5e
topology: v5e:2x2
jax: 0.10.0
libtpu: 0.0.40
codegen_flags: <defaults>
</compile_context>

<pallas_src>
import functools

import jax
import jax.numpy as jnp
from jax.experimental import pallas as pl
from jax.experimental.pallas import tpu as pltpu


def _dqn_mlp_kernel(num_hidden, *refs):
    """Whole-network forward for one batch tile.

    refs = (x_ref, W0, b0, W1, b1, ..., W_last, b_last, out_ref)
    Hidden layers: tanh(X @ W + b).  Final layer: X @ W + b (no activation).
    """
    x_ref = refs[0]
    out_ref = refs[-1]
    param_refs = refs[1:-1]

    h = x_ref[...]  # already f32
    for i in range(num_hidden):
        w = param_refs[2 * i][...]
        b = param_refs[2 * i + 1][...]
        h = jnp.tanh(jnp.dot(h, w, preferred_element_type=jnp.float32) + b)
    w_out = param_refs[-2][...]
    b_out = param_refs[-1][...]
    out_ref[...] = (
        jnp.dot(h, w_out, preferred_element_type=jnp.float32) + b_out
    ).astype(out_ref.dtype)


def dqn_forward(x, params, *, batch_tile=256):
    """params: flat list [W0, b0, W1, b1, ..., W_last, b_last] (W as [in, out]).

    Returns the same [B, K] float32 result as DQN.forward(X) in PyTorch.
    """
    num_layers = len(params) // 2
    num_hidden = num_layers - 1
    B, D = x.shape
    K = params[-1].shape[-1]

    kernel = functools.partial(_dqn_mlp_kernel, num_hidden)

    # --- Small-batch / latency path: one full-array block, no grid. ---------
    if B <= batch_tile:
        vmem_spec = pl.BlockSpec(memory_space=pltpu.VMEM)
        return pl.pallas_call(
            kernel,
            out_shape=jax.ShapeDtypeStruct((B, K), jnp.float32),
            in_specs=[vmem_spec] * (1 + len(params)),
            out_specs=vmem_spec,
        )(x, *params)

    # --- Large-batch path: tile batch axis, keep weights VMEM-resident. -----
    TB = batch_tile                      # multiple of 8 (sublane); tiny widths
    B_pad = pl.cdiv(B, TB) * TB          # keep VMEM use far below any limit
    if B_pad != B:
        x = jnp.pad(x, ((0, B_pad - B), (0, 0)))

    x_spec = pl.BlockSpec((TB, D), lambda i: (i, 0))
    out_spec = pl.BlockSpec((TB, K), lambda i: (i, 0))
    # Full-array blocks with a constant index_map: weights/biases are DMA'd
    # once and stay resident in VMEM across all batch-tile iterations.
    param_specs = [pl.BlockSpec(p.shape, lambda i: (0, 0)) for p in params]

    out = pl.pallas_call(
        kernel,
        out_shape=jax.ShapeDtypeStruct((B_pad, K), jnp.float32),
        grid=(B_pad // TB,),
        in_specs=[x_spec] + param_specs,
        out_specs=out_spec,
        compiler_params=pltpu.CompilerParams(
            dimension_semantics=("parallel",),  # megacore: split batch on v7x
        ),
    )(x, *params)
    return out[:B]


def init_dqn_params(key, D, K, hidden_layer_sizes):
    """Deterministic init mirroring the module's __init__ shapes.

    Hidden W ~ Normal(0, sqrt(2/M1)) (as in HiddenLayer), biases ~ small
    uniform (PyTorch-Linear fan-in bound).  Final layer uses default-Linear
    style init.  Weights stored as [in, out]; biases as [1, out].
    """
    params = []
    fan_in = D
    for M in hidden_layer_sizes:
        key, kw, kb = jax.random.split(key, 3)
        W = jax.random.normal(kw, (fan_in, M), jnp.float32) * jnp.sqrt(2.0 / fan_in)
        bound = 1.0 / jnp.sqrt(float(fan_in))
        b = jax.random.uniform(kb, (1, M), jnp.float32, -bound, bound)
        params += [W, b]
        fan_in = M
    key, kw, kb = jax.random.split(key, 3)
    bound = 1.0 / jnp.sqrt(float(fan_in))
    W = jax.random.uniform(kw, (fan_in, K), jnp.float32, -bound, bound)
    b = jax.random.uniform(kb, (1, K), jnp.float32, -bound, bound)
    params += [W, b]
    return params


def dqn_forward_ref(x, params):
    """Pure-JAX reference for correctness checking."""
    num_layers = len(params) // 2
    h = x
    for i in range(num_layers - 1):
        h = jnp.tanh(h @ params[2 * i] + params[2 * i + 1])
    return h @ params[-2] + params[-1]


if __name__ == "__main__":
    # CartPole-like DQN: D=4 state dims, K=2 actions, hidden=[32, 32].
    D, K = 4, 2
    hidden_layer_sizes = [32, 32]

    key = jax.random.PRNGKey(0)
    key, kx_small, kx_big = jax.random.split(key, 3)
    params = init_dqn_params(key, D, K, hidden_layer_sizes)

    # 1) Replay-batch sized call (B = module's batch_size = 32): latency path.
    B_small = 32
    x_small = jax.random.normal(kx_small, (B_small, D), jnp.float32)
    out_small = jax.block_until_ready(dqn_forward(x_small, params))
    ref_small = dqn_forward_ref(x_small, params)
    assert out_small.shape == (B_small, K)
    assert jnp.allclose(out_small, ref_small, atol=1e-5, rtol=1e-5), \
        "small-batch mismatch vs reference"

    # 2) Batched / vectorized-env sized call: exercises the batch-tiled grid
    #    path (weights VMEM-resident, "parallel" batch axis), incl. padding.
    B_big = 600  # not a multiple of the 256-row tile -> tests pad + slice
    x_big = jax.random.normal(kx_big, (B_big, D), jnp.float32)
    out_big = jax.block_until_ready(dqn_forward(x_big, params, batch_tile=256))
    ref_big = dqn_forward_ref(x_big, params)
    assert out_big.shape == (B_big, K)
    assert jnp.allclose(out_big, ref_big, atol=1e-5, rtol=1e-5), \
        "tiled-batch mismatch vs reference"

    print("KERNEL_OK")
</pallas_src>

<mosaic_0001>
module attributes {stable_mosaic.version = 11 : i64} {
  func.func @_dqn_mlp_kernel(%arg0: memref<32x4xf32, #tpu.memory_space<vmem>>, %arg1: memref<4x32xf32, #tpu.memory_space<vmem>>, %arg2: memref<1x32xf32, #tpu.memory_space<vmem>>, %arg3: memref<32x32xf32, #tpu.memory_space<vmem>>, %arg4: memref<1x32xf32, #tpu.memory_space<vmem>>, %arg5: memref<32x2xf32, #tpu.memory_space<vmem>>, %arg6: memref<1x2xf32, #tpu.memory_space<vmem>>, %arg7: memref<32x2xf32, #tpu.memory_space<vmem>>) attributes {dimension_semantics = [], scalar_prefetch = 0 : i64, scratch_operands = 0 : i64, tpu.core_type = #tpu.core_type<tc>} {
    %c0 = arith.constant 0 : index
    %c0_0 = arith.constant 0 : index
    %0 = vector.load %arg0[%c0, %c0_0] : memref<32x4xf32, #tpu.memory_space<vmem>>, vector<32x4xf32>
    %c0_1 = arith.constant 0 : index
    %c0_2 = arith.constant 0 : index
    %1 = vector.load %arg1[%c0_1, %c0_2] : memref<4x32xf32, #tpu.memory_space<vmem>>, vector<4x32xf32>
    %c0_3 = arith.constant 0 : index
    %c0_4 = arith.constant 0 : index
    %2 = vector.load %arg2[%c0_3, %c0_4] : memref<1x32xf32, #tpu.memory_space<vmem>>, vector<1x32xf32>
    %cst = arith.constant dense<0.000000e+00> : vector<32x32xf32>
    %3 = tpu.matmul %0, %1, %cst {dimension_numbers = #tpu.dot_dimension_numbers<[1], [0], [0], [1], [0, 0, 1, 1], [], []>} : vector<32x4xf32>, vector<4x32xf32>, vector<32x32xf32> -> vector<32x32xf32>
    %4 = vector.broadcast %2 : vector<1x32xf32> to vector<32x32xf32>
    %5 = arith.addf %3, %4 : vector<32x32xf32>
    %6 = math.tanh %5 : vector<32x32xf32>
    %c0_5 = arith.constant 0 : index
    %c0_6 = arith.constant 0 : index
    %7 = vector.load %arg3[%c0_5, %c0_6] : memref<32x32xf32, #tpu.memory_space<vmem>>, vector<32x32xf32>
    %c0_7 = arith.constant 0 : index
    %c0_8 = arith.constant 0 : index
    %8 = vector.load %arg4[%c0_7, %c0_8] : memref<1x32xf32, #tpu.memory_space<vmem>>, vector<1x32xf32>
    %cst_9 = arith.constant dense<0.000000e+00> : vector<32x32xf32>
    %9 = tpu.matmul %6, %7, %cst_9 {dimension_numbers = #tpu.dot_dimension_numbers<[1], [0], [0], [1], [0, 0, 1, 1], [], []>} : vector<32x32xf32>, vector<32x32xf32>, vector<32x32xf32> -> vector<32x32xf32>
    %10 = vector.broadcast %8 : vector<1x32xf32> to vector<32x32xf32>
    %11 = arith.addf %9, %10 : vector<32x32xf32>
    %12 = math.tanh %11 : vector<32x32xf32>
    %c0_10 = arith.constant 0 : index
    %c0_11 = arith.constant 0 : index
    %13 = vector.load %arg5[%c0_10, %c0_11] : memref<32x2xf32, #tpu.memory_space<vmem>>, vector<32x2xf32>
    %c0_12 = arith.constant 0 : index
    %c0_13 = arith.constant 0 : index
    %14 = vector.load %arg6[%c0_12, %c0_13] : memref<1x2xf32, #tpu.memory_space<vmem>>, vector<1x2xf32>
    %cst_14 = arith.constant dense<0.000000e+00> : vector<32x2xf32>
    %15 = tpu.matmul %12, %13, %cst_14 {dimension_numbers = #tpu.dot_dimension_numbers<[1], [0], [0], [1], [0, 0, 1, 1], [], []>} : vector<32x32xf32>, vector<32x2xf32>, vector<32x2xf32> -> vector<32x2xf32>
    %16 = vector.broadcast %14 : vector<1x2xf32> to vector<32x2xf32>
    %17 = arith.addf %15, %16 : vector<32x2xf32>
    %c0_15 = arith.constant 0 : index
    %c0_16 = arith.constant 0 : index
    %18 = vector.load %arg7[%c0_15, %c0_16] : memref<32x2xf32, #tpu.memory_space<vmem>>, vector<32x2xf32>
    tpu.vector_store %arg7[%c0_15, %c0_16], %17 {strides = array<i32>} : memref<32x2xf32, #tpu.memory_space<vmem>>, vector<32x2xf32>,
    return
  }
}

</mosaic_0001>

<bundles_post_ra>
// kernel: tpu_custom_call.1
= control target key start
LH: loop header
LB: loop body
LE: loop exit
PB: predicated region body
PF: predicated region fallthrough
CT: control target
= control target key end

     0   :  { %vm48_vm0 = vcmask 1043456   ;;  %vm35_vm1 = vcmask 31744   ;;  %vm93_vm2 = vcmask 261120   ;;  %vm188_vm3 = vcmask 15360   ;;  %s345_s1 = inlined_call_operand.vmem [shape: f32[4,32], index: 1, kind: input, shape index: {}]   ;;  %s346_s0 = inlined_call_operand.vmem [shape: f32[32,4], index: 0, kind: input, shape index: {}]   ;;  %s347_s2 = inlined_call_operand.vmem [shape: f32[1,32], index: 2, kind: input, shape index: {}]   ;;  %s348_s4 = inlined_call_operand.vmem [shape: f32[1,32], index: 4, kind: input, shape index: {}]   ;;  %s349_s3 = inlined_call_operand.vmem [shape: f32[32,32], index: 3, kind: input, shape index: {}]   ;;  %s350_s6 = inlined_call_operand.vmem [shape: f32[1,2], index: 6, kind: input, shape index: {}]   ;;  %s351_s5 = inlined_call_operand.vmem [shape: f32[32,2], index: 5, kind: input, shape index: {}]   ;;  %s352_s7 = inlined_call_operand.vmem [shape: f32[32,2], index: 7, kind: output, shape index: {}]  }
   0x1   :  { %v30_v0 = vld [vmem:[%s345_s1] sm:$0xf]  ;;  %v27_v2 = vld [vmem:[%s346_s0 + $0x8] sm:$0xff]  ;;  %v28_v3 = vld [vmem:[%s346_s0 + $0x10] sm:$0xff] }
   0x2   :  { %v26_v1 = vld [vmem:[%s346_s0] sm:$0xff]  ;;  %197 = vmatpush.msk.msra.mxu0 %vm48_vm0, %v30_v0  ;;  %v29_v4 = vld [vmem:[%s346_s0 + $0x18] sm:$0xff]  ;;  %v87_v6 = vld [vmem:[%s349_s3 + $0x10] sm:$0xff] }
   0x3   :  { %198 = vmatmul.msk.f32.vlgmr.msra.gmra.mxu0 %vm35_vm1, %v26_v1  ;;  %v88_v5 = vld [vmem:[%s349_s3 + $0x18] sm:$0xff]  ;;  %v86_v7 = vld [vmem:[%s349_s3 + $0x8] sm:$0xff]  ;;  %v85_v8 = vld [vmem:[%s349_s3] sm:$0xff] }
   0x4   :  { %118 = vmatpush.msra.mxu1 %v88_v5  ;;  %210 = vmatpush.msra.mxu3 %v88_v5  ;;  %v218_v9 = vld [vmem:[%s347_s2] ss:$0 sm:$0xff]  ;;  %v142_v22 = vld [vmem:[%s351_s5 + $0x18] sm:$0xff]  ;;  %v141_v23 = vld [vmem:[%s351_s5 + $0x10] sm:$0xff] }
   0x5   :  { %214 = vmatpush.msra.mxu2 %v142_v22  ;;  %v140_v24 = vld [vmem:[%s351_s5 + $0x8] sm:$0xff]  ;;  %v139_v25 = vld [vmem:[%s351_s5] sm:$0xff] }
   0x6   :  { %119 = vmatpush.msra.mxu1 %v87_v6  ;;  %211 = vmatpush.msra.mxu3 %v87_v6  ;;  %v219_v26 = vld [vmem:[%s348_s4] ss:$0 sm:$0xff] }
   0x7   :  { %215 = vmatpush.msra.mxu2 %v141_v23  ;;  %v220_v39 = vld [vmem:[%s350_s6] ss:$0 sm:$0xff] }
   0x8   :  { %120 = vmatpush.msra.mxu1 %v86_v7  ;;  %212 = vmatpush.msra.mxu3 %v86_v7 }
   0x9   :  { %216 = vmatpush.msra.mxu2 %v140_v24 }
   0xa   :  { %121 = vmatpush.msra.mxu1 %v85_v8  ;;  %213 = vmatpush.msra.mxu3 %v85_v8 }
   0xb   :  { %199 = vmatmul.msk.f32.gmra.mxu0 %vm35_vm1, %v27_v2  ;;  %217 = vmatpush.msra.mxu2 %v139_v25 }
   0xc   :  { %171 = vmatpush.msrb.mxu1 %v142_v22 }
   0xe   :  { %172 = vmatpush.msrb.mxu1 %v141_v23 }
  0x10   :  { %173 = vmatpush.msrb.mxu1 %v140_v24 }
  0x12   :  { %174 = vmatpush.msrb.mxu1 %v139_v25 }
  0x13   :  { %200 = vmatmul.msk.f32.gmra.mxu0 %vm35_vm1, %v28_v3 }
  0x1b   :  { %201 = vmatmul.msk.f32.gmra.mxu0 %vm35_vm1, %v29_v4 }
  0x80   :  { %v69_v10 = vpop.f32.mrf.mxu0 }
  0x81   :  { %v70_v11 = vadd.f32 %v218_v9, %v69_v10 }
  0x83   :  { %221 = vtanh.f32 %v70_v11 }
  0x88   :  { %v72_v12 = vpop.f32.mrf.mxu0 }
  0x89   :  { %v222_v13 = vpop.eup %221  ;;  %v73_v14 = vadd.f32 %v218_v9, %v72_v12 }
  0x8a   :  { %202 = vmatmul.msk.f32.vlgmr.msra.gmra.mxu1 %vm93_vm2, %v222_v13 }
  0x8b   :  { %223 = vtanh.f32 %v73_v14 }
  0x90   :  { %v75_v15 = vpop.f32.mrf.mxu0 }
  0x91   :  { %v224_v16 = vpop.eup %223  ;;  %v76_v17 = vadd.f32 %v218_v9, %v75_v15 }
  0x92   :  { %203 = vmatmul.msk.f32.vlgmr.msra.gmra.mxu3 %vm93_vm2, %v224_v16 }
  0x93   :  { %225 = vtanh.f32 %v76_v17 }
  0x98   :  { %v78_v18 = vpop.f32.mrf.mxu0 }
  0x99   :  { %v226_v19 = vpop.eup %225  ;;  %v79_v20 = vadd.f32 %v218_v9, %v78_v18 }
  0x9a   :  { %204 = vmatmul.msk.f32.gmra.mxu3 %vm93_vm2, %v226_v19 }
  0x9b   :  { %227 = vtanh.f32 %v79_v20 }
  0xa1   :  { %v228_v21 = vpop.eup %227 }
  0xa2   :  { %205 = vmatmul.msk.f32.gmra.mxu3 %vm93_vm2, %v228_v21 }
 0x107   :  { %v123_v27 = vpop.f32.mrf.mxu1 }
 0x108   :  { %v124_v28 = vadd.f32 %v219_v26, %v123_v27 }
 0x10a   :  { %229 = vtanh.f32 %v124_v28 }
 0x110   :  { %v230_v29 = vpop.eup %229 }
 0x111   :  { %206 = vmatmul.msk.f32.vlgmr.msrb.gmra.mxu1 %vm93_vm2, %v230_v29 }
 0x115   :  { %v126_v30 = vpop.f32.mrf.mxu3 }
 0x116   :  { %v127_v31 = vadd.f32 %v219_v26, %v126_v30 }
 0x118   :  { %231 = vtanh.f32 %v127_v31 }
 0x11d   :  { %v129_v32 = vpop.f32.mrf.mxu3 }
 0x11e   :  { %v232_v33 = vpop.eup %231  ;;  %v130_v34 = vadd.f32 %v219_v26, %v129_v32 }
 0x11f   :  { %207 = vmatmul.msk.f32.vlgmr.msra.gmra.mxu2 %vm93_vm2, %v232_v33 }
 0x120   :  { %233 = vtanh.f32 %v130_v34 }
 0x125   :  { %v132_v35 = vpop.f32.mrf.mxu3 }
 0x126   :  { %v234_v36 = vpop.eup %233  ;;  %v133_v37 = vadd.f32 %v219_v26, %v132_v35 }
 0x127   :  { %208 = vmatmul.msk.f32.gmra.mxu2 %vm93_vm2, %v234_v36 }
 0x128   :  { %235 = vtanh.f32 %v133_v37 }
 0x12e   :  { %v236_v38 = vpop.eup %235 }
 0x12f   :  { %209 = vmatmul.msk.f32.gmra.mxu2 %vm93_vm2, %v236_v38 }
 0x18e   :  { %v176_v40 = vpop.f32.mrf.mxu1 }
 0x18f   :  { %v177_v41 = vadd.f32 %v220_v39, %v176_v40 }
 0x191   :  { %189 = vst.msk [vmem:[%s352_s7] sm:$0xff] %vm188_vm3, %v177_v41 }
 0x1a2   :  { %v179_v42 = vpop.f32.mrf.mxu2 }
 0x1a3   :  { %v180_v43 = vadd.f32 %v220_v39, %v179_v42 }
 0x1a5   :  { %190 = vst.msk [vmem:[%s352_s7 + $0x8] sm:$0xff] %vm188_vm3, %v180_v43 }
 0x1aa   :  { %v182_v44 = vpop.f32.mrf.mxu2 }
 0x1ab   :  { %v183_v45 = vadd.f32 %v220_v39, %v182_v44 }
 0x1ad   :  { %191 = vst.msk [vmem:[%s352_s7 + $0x10] sm:$0xff] %vm188_vm3, %v183_v45 }
 0x1b2   :  { %v185_v46 = vpop.f32.mrf.mxu2 }
 0x1b3   :  { %v186_v47 = vadd.f32 %v220_v39, %v185_v46 }
 0x1b5   :  { %192 = vst.msk [vmem:[%s352_s7 + $0x18] sm:$0xff] %vm188_vm3, %v186_v47 }

</bundles_post_ra>
